<compile_context>
chip_gen: v6e
topology: v6e:2x2x1
jax: 0.10.0
libtpu: 0.0.40
codegen_flags: <defaults>
</compile_context>

<pallas_src>
import jax
import jax.numpy as jnp
from jax.experimental import pallas as pl
from jax.experimental.pallas import tpu as pltpu


def _round_up(n, m):
    return ((n + m - 1) // m) * m


def _sublane_rows(dtype):
    """Native packed sublane multiple: 8 (4-byte), 16 (2-byte), 32 (1-byte)."""
    return {4: 8, 2: 16, 1: 32}.get(jnp.dtype(dtype).itemsize, 8)


def _vmem_budgets():
    """(per-activation-block byte budget, scoped vmem_limit_bytes)."""
    try:
        phys = int(pltpu.get_tpu_info().vmem_capacity_bytes)
    except Exception:
        phys = 64 * 1024 * 1024                        # conservative: v7x-sized
    if phys >= 96 * 1024 * 1024:                       # v5e / v6e: 128 MiB physical
        return 8 * 1024 * 1024, 96 * 1024 * 1024
    return 6 * 1024 * 1024, 48 * 1024 * 1024           # v7x: 64 MiB physical


def _pick_tile_rows(rows, d, itemsize, sublane, block_budget):
    """Row tile for the (rows, D) activation slab.

    * multiple of the packed-dtype sublane count,
    * sized so one (tile, D) block is ~block_budget bytes (2x double-buffered
      input + 2x output blocks + single-buffered weights stay inside the
      scoped-VMEM limit on every generation),
    * when the whole input would fit in fewer than 4 blocks, split into ~4
      tiles so both v7x TensorCores get >= 2 pipelined grid steps each,
    * prefer an exact divisor of `rows` so there is no ragged tail block and
      never an HBM pad copy.
    """
    cap = max(sublane, (block_budget // max(1, d * itemsize)) // sublane * sublane)
    if rows >= 4 * sublane:
        cap = min(cap, _round_up(-(-rows // 4), sublane))     # >= 4 grid steps
    tile = min(cap, _round_up(rows, sublane))
    if rows % sublane == 0 and rows % tile != 0:
        t = tile
        while t >= max(sublane, tile // 2):                   # cheap trace-time search
            if rows % t == 0:
                return t
            t -= sublane
    return tile


# ---------------------------------------------------------------------------
# Kernels
# ---------------------------------------------------------------------------

def _pe_project_sum_kernel(x_ref, s_ref, wt_ref, b_ref, out_ref):
    # x: (T, D); s: (T, 5); wt: (5, D); b: (1, D).
    # K=5 contraction as VPU broadcast FMAs (no sliver MXU matmul).
    s = s_ref[...].astype(jnp.float32)
    w = wt_ref[...].astype(jnp.float32)
    ct = b_ref[...].astype(jnp.float32)                       # (1, D) broadcasts over rows
    for k in range(5):                                        # unrolled, static slices
        ct = ct + s[:, k:k + 1] * w[k:k + 1, :]
    out_ref[...] = (x_ref[...].astype(jnp.float32) + ct).astype(out_ref.dtype)


def _pe_concat_process_kernel(x_ref, s_ref, w1x_ref, w1s_ref, b1_ref,
                              w2_ref, b2_ref, out_ref):
    # x: (T, D); s: (T, 5); w1x: (D, D); w1s: (5, D); w2: (D, D); b1, b2: (1, D).
    # MXU operands use the weight dtype (bf16 if mxu_bf16 was requested),
    # accumulation is always f32.
    mxu_dt = w1x_ref.dtype
    h = jnp.dot(x_ref[...].astype(mxu_dt), w1x_ref[...],
                preferred_element_type=jnp.float32)
    s = s_ref[...].astype(jnp.float32)
    w1s = w1s_ref[...].astype(jnp.float32)
    for k in range(5):                                        # VPU broadcast FMAs
        h = h + s[:, k:k + 1] * w1s[k:k + 1, :]
    h = jnp.maximum(h + b1_ref[...].astype(jnp.float32), 0.0)
    out = jnp.dot(h.astype(w2_ref.dtype), w2_ref[...],
                  preferred_element_type=jnp.float32)
    out_ref[...] = (out + b2_ref[...].astype(jnp.float32)).astype(out_ref.dtype)


# ---------------------------------------------------------------------------
# Wrapper
# ---------------------------------------------------------------------------

def positional_encoding_image_boxes(x, boxes, params, mode="project-and-sum",
                                    tile_rows=None, mxu_bf16=False,
                                    donate_x=False):
    """x: (S, B, D); boxes: (Bb, S, 4) with Bb == B or Bb == 1 (torch .expand)."""
    S, B, D = x.shape
    Bb, Sb, nbx = boxes.shape
    assert Sb == S and nbx == 4

    # --- wrapper-side glue (XLA): area / concat / transpose / flatten -------
    boxes = boxes.astype(jnp.float32)
    area = (boxes[:, :, 2] - boxes[:, :, 0]) * (boxes[:, :, 3] - boxes[:, :, 1])
    s_infos = jnp.concatenate([boxes, area[..., None]], axis=2)      # (Bb, S, 5)
    s_infos = jnp.transpose(s_infos, (1, 0, 2))                      # (S, Bb, 5)
    if Bb != B:                                                      # torch .expand
        s_infos = jnp.broadcast_to(s_infos, (S, B, 5))
    s_flat = s_infos.reshape(S * B, 5)
    x_flat = x.reshape(S * B, D)

    rows = S * B
    itemsize = jnp.dtype(x.dtype).itemsize
    sublane = _sublane_rows(x.dtype)
    block_budget, vmem_limit = _vmem_budgets()
    if tile_rows is None:
        tile_rows = _pick_tile_rows(rows, D, itemsize, sublane, block_budget)
    tile_rows = max(sublane, (tile_rows // sublane) * sublane)

    n_tiles = pl.cdiv(rows, tile_rows)                               # ragged OK: no pad copy

    x_spec = pl.BlockSpec((tile_rows, D), lambda i: (i, 0))
    s_spec = pl.BlockSpec((tile_rows, 5), lambda i: (i, 0))
    out_spec = pl.BlockSpec((tile_rows, D), lambda i: (i, 0))
    # Constant index_map keeps weights resident across the whole grid;
    # Buffered(1) single-buffers them (no wasted second VMEM copy).
    wspec = lambda shape: pl.BlockSpec(shape, lambda i: (0,) * len(shape),
                                       pipeline_mode=pl.Buffered(1))

    cparams = pltpu.CompilerParams(
        dimension_semantics=("parallel",),
        vmem_limit_bytes=vmem_limit,
    )

    if mode == "project-and-sum":
        wt = params["wt"]                                            # (5, D)
        b = params["b"].reshape(1, D)
        cost = pl.CostEstimate(
            flops=int(rows * D * 11),
            transcendentals=0,
            bytes_accessed=int(2 * rows * D * itemsize
                               + rows * 5 * 4 + (5 * D + D) * 4),
        )
        out_flat = pl.pallas_call(
            _pe_project_sum_kernel,
            out_shape=jax.ShapeDtypeStruct((rows, D), x.dtype),
            grid_spec=pltpu.PrefetchScalarGridSpec(
                num_scalar_prefetch=0,
                grid=(n_tiles,),
                in_specs=[x_spec, s_spec, wspec((5, D)), wspec((1, D))],
                out_specs=out_spec,
            ),
            compiler_params=cparams,
            cost_estimate=cost,
            input_output_aliases={0: 0} if donate_x else {},
        )(x_flat, s_flat, wt, b)

    elif mode == "concat-and-process":
        w1t = params["w1t"]                                          # (D + 5, D)
        mxu_dt = jnp.bfloat16 if mxu_bf16 else w1t.dtype
        w1x = w1t[:D, :].astype(mxu_dt)                              # host-side split + cast
        w1s = w1t[D:, :]                                             # stays on the VPU path
        b1 = params["b1"].reshape(1, D)
        w2 = params["w2t"].astype(mxu_dt)                            # (D, D)
        b2 = params["b2"].reshape(1, D)
        wbytes = jnp.dtype(mxu_dt).itemsize
        cost = pl.CostEstimate(
            flops=int(4 * rows * D * D + rows * D * 14),
            transcendentals=0,
            bytes_accessed=int(2 * rows * D * itemsize + rows * 5 * 4
                               + 2 * D * D * wbytes + 7 * D * 4),
        )
        out_flat = pl.pallas_call(
            _pe_concat_process_kernel,
            out_shape=jax.ShapeDtypeStruct((rows, D), x.dtype),
            grid_spec=pltpu.PrefetchScalarGridSpec(
                num_scalar_prefetch=0,
                grid=(n_tiles,),
                in_specs=[x_spec, s_spec, wspec((D, D)), wspec((5, D)),
                          wspec((1, D)), wspec((D, D)), wspec((1, D))],
                out_specs=out_spec,
            ),
            compiler_params=cparams,
            cost_estimate=cost,
        )(x_flat, s_flat, w1x, w1s, b1, w2, b2)
    else:
        raise ValueError(f"unknown mode {mode}")

    return out_flat.reshape(S, B, D)


# ---------------------------------------------------------------------------
# Pure-JAX reference mirroring the PyTorch forward exactly
# ---------------------------------------------------------------------------

def _ref_forward(x, boxes, params, mode):
    area = (boxes[:, :, 2] - boxes[:, :, 0]) * (boxes[:, :, 3] - boxes[:, :, 1])
    s_infos = jnp.concatenate([boxes, area[..., None]], axis=2)      # (Bb, S, 5)
    if mode == "project-and-sum":
        ct = s_infos @ params["wt"] + params["b"]                    # (Bb, S, D)
        ct = jnp.transpose(ct, (1, 0, 2))                            # (S, Bb, D)
        return x + ct                                                # expand over batch
    else:
        s = jnp.transpose(s_infos, (1, 0, 2))                        # (S, Bb, 5)
        s = jnp.broadcast_to(s, (x.shape[0], x.shape[1], 5))
        xc = jnp.concatenate([x.astype(jnp.float32), s], axis=2)
        h = jnp.maximum(xc @ params["w1t"] + params["b1"], 0.0)
        return h @ params["w2t"] + params["b2"]


# ---------------------------------------------------------------------------
# Demo / self-check
# ---------------------------------------------------------------------------

def _make_inputs(kx, kb0, kb1, S, B, D, dtype=jnp.float32):
    x = jax.random.normal(kx, (S, B, D), jnp.float32).astype(dtype)
    xy0 = jax.random.uniform(kb0, (B, S, 2), jnp.float32, 0.0, 0.5)
    wh = jax.random.uniform(kb1, (B, S, 2), jnp.float32, 0.0, 0.5)
    boxes = jnp.concatenate([xy0, xy0 + wh], axis=2)                 # (B, S, 4)
    return x, boxes


def _make_ps_params(k1, k2, D):
    bnd = 1.0 / jnp.sqrt(5.0)
    return {"wt": jax.random.uniform(k1, (5, D), jnp.float32, -bnd, bnd),
            "b": jax.random.uniform(k2, (D,), jnp.float32, -bnd, bnd)}


def _make_cp_params(k1, k2, k3, D):
    b1 = 1.0 / jnp.sqrt(float(D + 5))
    b2 = 1.0 / jnp.sqrt(float(D))
    return {"w1t": jax.random.uniform(k1, (D + 5, D), jnp.float32, -b1, b1),
            "b1": jax.random.uniform(k2, (D,), jnp.float32, -b1, b1),
            "w2t": jax.random.uniform(k3, (D, D), jnp.float32, -b2, b2),
            "b2": jnp.zeros((D,), jnp.float32)}


def _check(name, out, ref, atol, rtol):
    jax.block_until_ready(out)
    ok = jnp.allclose(out.astype(jnp.float32), ref.astype(jnp.float32),
                      atol=atol, rtol=rtol)
    assert bool(ok), f"{name} mismatch"


if __name__ == "__main__":
    key = jax.random.PRNGKey(0)
    ks = jax.random.split(key, 12)

    # ---- small shapes: S=8, B=2, D=32 (single tile) -------------------------
    S, B, D = 8, 2, 32
    x, boxes = _make_inputs(ks[0], ks[1], ks[2], S, B, D)
    params_ps = _make_ps_params(ks[3], ks[4], D)
    params_cp = _make_cp_params(ks[5], ks[6], ks[7], D)

    out = positional_encoding_image_boxes(x, boxes, params_ps, "project-and-sum")
    _check("project-and-sum", out, _ref_forward(x, boxes, params_ps, "project-and-sum"),
           1e-5, 1e-5)

    # boxes with batch 1 exercises the torch .expand(-1, bs, -1) path.
    boxes1 = boxes[:1]
    out1 = positional_encoding_image_boxes(x, boxes1, params_ps, "project-and-sum")
    _check("expand path", out1, _ref_forward(x, boxes1, params_ps, "project-and-sum"),
           1e-5, 1e-5)

    out2 = positional_encoding_image_boxes(x, boxes, params_cp, "concat-and-process")
    _check("concat-and-process", out2,
           _ref_forward(x, boxes, params_cp, "concat-and-process"), 1e-4, 1e-4)

    # ---- multi-tile, lane-dense: S=40, B=4, D=128 (grid of 4 tiles) ---------
    S2, B2, D2 = 40, 4, 128
    x2, boxes2 = _make_inputs(ks[8], ks[9], ks[10], S2, B2, D2)
    params_ps2 = _make_ps_params(ks[3], ks[4], D2)
    params_cp2 = _make_cp_params(ks[5], ks[6], ks[7], D2)

    out3 = positional_encoding_image_boxes(x2, boxes2, params_ps2, "project-and-sum")
    _check("project-and-sum multi-tile", out3,
           _ref_forward(x2, boxes2, params_ps2, "project-and-sum"), 1e-5, 1e-5)

    out4 = positional_encoding_image_boxes(x2, boxes2, params_cp2, "concat-and-process")
    _check("concat-and-process multi-tile", out4,
           _ref_forward(x2, boxes2, params_cp2, "concat-and-process"), 2e-3, 2e-3)

    # ---- bf16 activations: dtype-aware 16-row sublane tiles -----------------
    x2b = x2.astype(jnp.bfloat16)
    out5 = positional_encoding_image_boxes(x2b, boxes2, params_ps2, "project-and-sum")
    _check("project-and-sum bf16", out5,
           _ref_forward(x2b, boxes2, params_ps2, "project-and-sum"), 3e-2, 3e-2)

    print("KERNEL_OK")
</pallas_src>

<mosaic_0001>
module attributes {stable_mosaic.version = 11 : i64} {
  func.func @_pe_project_sum_kernel(%arg0: i32, %arg1: memref<16x32xf32, #tpu.memory_space<vmem>>, %arg2: memref<16x5xf32, #tpu.memory_space<vmem>>, %arg3: memref<5x32xf32, #tpu.memory_space<vmem>>, %arg4: memref<1x32xf32, #tpu.memory_space<vmem>>, %arg5: memref<16x32xf32, #tpu.memory_space<vmem>>) attributes {dimension_semantics = [#tpu.dimension_semantics<parallel>], iteration_bounds = array<i64: 1>, scalar_prefetch = 0 : i64, scratch_operands = 0 : i64, tpu.core_type = #tpu.core_type<tc>, window_params = [{transform_indices = @transform_0, window_bounds = array<i64: 16, 32>}, {transform_indices = @transform_1, window_bounds = array<i64: 16, 5>}, {pipeline_mode = #tpu.pipeline_mode<synchronous>, transform_indices = @transform_2, window_bounds = array<i64: 5, 32>}, {pipeline_mode = #tpu.pipeline_mode<synchronous>, transform_indices = @transform_3, window_bounds = array<i64: 1, 32>}, {transform_indices = @transform_4, window_bounds = array<i64: 16, 32>}]} {
    %c0 = arith.constant 0 : index
    %c0_0 = arith.constant 0 : index
    %0 = vector.load %arg2[%c0, %c0_0] : memref<16x5xf32, #tpu.memory_space<vmem>>, vector<16x5xf32>
    %c0_1 = arith.constant 0 : index
    %c0_2 = arith.constant 0 : index
    %1 = vector.load %arg3[%c0_1, %c0_2] : memref<5x32xf32, #tpu.memory_space<vmem>>, vector<5x32xf32>
    %c0_3 = arith.constant 0 : index
    %c0_4 = arith.constant 0 : index
    %2 = vector.load %arg4[%c0_3, %c0_4] : memref<1x32xf32, #tpu.memory_space<vmem>>, vector<1x32xf32>
    %3 = vector.extract_strided_slice %0 {offsets = [0, 0], sizes = [16, 1], strides = [1, 1]} : vector<16x5xf32> to vector<16x1xf32>
    %4 = vector.extract_strided_slice %1 {offsets = [0, 0], sizes = [1, 32], strides = [1, 1]} : vector<5x32xf32> to vector<1x32xf32>
    %5 = vector.broadcast %3 : vector<16x1xf32> to vector<16x32xf32>
    %6 = vector.broadcast %4 : vector<1x32xf32> to vector<16x32xf32>
    %7 = arith.mulf %5, %6 : vector<16x32xf32>
    %8 = vector.broadcast %2 : vector<1x32xf32> to vector<16x32xf32>
    %9 = arith.addf %8, %7 : vector<16x32xf32>
    %10 = vector.extract_strided_slice %0 {offsets = [0, 1], sizes = [16, 1], strides = [1, 1]} : vector<16x5xf32> to vector<16x1xf32>
    %11 = vector.extract_strided_slice %1 {offsets = [1, 0], sizes = [1, 32], strides = [1, 1]} : vector<5x32xf32> to vector<1x32xf32>
    %12 = vector.broadcast %10 : vector<16x1xf32> to vector<16x32xf32>
    %13 = vector.broadcast %11 : vector<1x32xf32> to vector<16x32xf32>
    %14 = arith.mulf %12, %13 : vector<16x32xf32>
    %15 = arith.addf %9, %14 : vector<16x32xf32>
    %16 = vector.extract_strided_slice %0 {offsets = [0, 2], sizes = [16, 1], strides = [1, 1]} : vector<16x5xf32> to vector<16x1xf32>
    %17 = vector.extract_strided_slice %1 {offsets = [2, 0], sizes = [1, 32], strides = [1, 1]} : vector<5x32xf32> to vector<1x32xf32>
    %18 = vector.broadcast %16 : vector<16x1xf32> to vector<16x32xf32>
    %19 = vector.broadcast %17 : vector<1x32xf32> to vector<16x32xf32>
    %20 = arith.mulf %18, %19 : vector<16x32xf32>
    %21 = arith.addf %15, %20 : vector<16x32xf32>
    %22 = vector.extract_strided_slice %0 {offsets = [0, 3], sizes = [16, 1], strides = [1, 1]} : vector<16x5xf32> to vector<16x1xf32>
    %23 = vector.extract_strided_slice %1 {offsets = [3, 0], sizes = [1, 32], strides = [1, 1]} : vector<5x32xf32> to vector<1x32xf32>
    %24 = vector.broadcast %22 : vector<16x1xf32> to vector<16x32xf32>
    %25 = vector.broadcast %23 : vector<1x32xf32> to vector<16x32xf32>
    %26 = arith.mulf %24, %25 : vector<16x32xf32>
    %27 = arith.addf %21, %26 : vector<16x32xf32>
    %28 = vector.extract_strided_slice %0 {offsets = [0, 4], sizes = [16, 1], strides = [1, 1]} : vector<16x5xf32> to vector<16x1xf32>
    %29 = vector.extract_strided_slice %1 {offsets = [4, 0], sizes = [1, 32], strides = [1, 1]} : vector<5x32xf32> to vector<1x32xf32>
    %30 = vector.broadcast %28 : vector<16x1xf32> to vector<16x32xf32>
    %31 = vector.broadcast %29 : vector<1x32xf32> to vector<16x32xf32>
    %32 = arith.mulf %30, %31 : vector<16x32xf32>
    %33 = arith.addf %27, %32 : vector<16x32xf32>
    %c0_5 = arith.constant 0 : index
    %c0_6 = arith.constant 0 : index
    %34 = vector.load %arg1[%c0_5, %c0_6] : memref<16x32xf32, #tpu.memory_space<vmem>>, vector<16x32xf32>
    %35 = arith.addf %34, %33 : vector<16x32xf32>
    %c0_7 = arith.constant 0 : index
    %c0_8 = arith.constant 0 : index
    %36 = vector.load %arg5[%c0_7, %c0_8] : memref<16x32xf32, #tpu.memory_space<vmem>>, vector<16x32xf32>
    tpu.vector_store %arg5[%c0_7, %c0_8], %35 {strides = array<i32>} : memref<16x32xf32, #tpu.memory_space<vmem>>, vector<16x32xf32>,
    return
  }
  func.func @transform_0(%arg0: i32) -> (i32, i32) {
    %c0_i32 = arith.constant 0 : i32
    %c0_i32_0 = arith.constant 0 : i32
    return %arg0, %c0_i32 : i32, i32
  }
  func.func @transform_1(%arg0: i32) -> (i32, i32) {
    %c0_i32 = arith.constant 0 : i32
    %c0_i32_0 = arith.constant 0 : i32
    return %arg0, %c0_i32 : i32, i32
  }
  func.func @transform_2(%arg0: i32) -> (i32, i32) {
    %c0_i32 = arith.constant 0 : i32
    %c0_i32_0 = arith.constant 0 : i32
    %c0_i32_1 = arith.constant 0 : i32
    return %c0_i32, %c0_i32_0 : i32, i32
  }
  func.func @transform_3(%arg0: i32) -> (i32, i32) {
    %c0_i32 = arith.constant 0 : i32
    %c0_i32_0 = arith.constant 0 : i32
    %c0_i32_1 = arith.constant 0 : i32
    return %c0_i32, %c0_i32_0 : i32, i32
  }
  func.func @transform_4(%arg0: i32) -> (i32, i32) {
    %c0_i32 = arith.constant 0 : i32
    %c0_i32_0 = arith.constant 0 : i32
    return %arg0, %c0_i32 : i32, i32
  }
}

</mosaic_0001>

<bundles_post_ra>
// kernel: tpu_custom_call.1
= control target key start
LH: loop header
LB: loop body
LE: loop exit
PB: predicated region body
PF: predicated region fallthrough
CT: control target
= control target key end

     0   :  { %v172_v1 = vmov 1   ;;  %v173_v2 = vmov 0   ;;  %s226_s0 = inlined_call_operand.vmem [shape: f32[16,32], index: 0, kind: input, shape index: {}]   ;;  %s227_s1 = inlined_call_operand.vmem [shape: f32[16,5], index: 1, kind: input, shape index: {}]   ;;  %s228_s2 = inlined_call_operand.vmem [shape: f32[5,32], index: 2, kind: input, shape index: {}]   ;;  %s229_s3 = inlined_call_operand.vmem [shape: f32[1,32], index: 3, kind: input, shape index: {}]   ;;  %s230_s4 = inlined_call_operand.hbm [shape: f32[16,32], index: 4, kind: output, shape index: {}]  }
   0x1   :  { %v18_v0 = vld [vmem:[%s227_s1] sm:$0xff]  ;;  %143 = vset.pattern.permute.xlu1 %v172_v1  ;;  %142 = vset.pattern.permute.xlu0 %v173_v2 }
   0x2   :  { %47 = vperm.xlu1 %143, %v18_v0   ;;  %24 = vperm.xlu0 %142, %v18_v0  }
   0x3   :  { %9 = vsyncpa [#allocation3], 0  ;;  %v19_v3 = vld [vmem:[%s227_s1 + $0x8] sm:$0xff]  ;;  %v174_v4 = vmov 2   ;;  %v175_v5 = vmov 3   ;;  %v176_v6 = vmov 4   ;;  %v32_v7 = vlaneseq }
   0x4   :  { %v20_v12 = vld [vmem:[%s228_s2] sm:$0x1f]  ;;  %vm114_vm0 = vcmask 261120   ;;  %s177_s22 = smov [#allocation2]   ;;  %v111_v52 = vld [vmem:[%s226_s0 + $0x8] sm:$0xff] }
   0x5   :  { %v33_v8 = vshrl.u32 %v32_v7, 7  ;;  %v133_v20 = vld [vmem:[%s229_s3] ss:$0 sm:$0xff]  ;;  %s122_s23 = sshll.u32 %s177_s22, 4  ;;  %s123_s23 = int_to_ptr.vmem [resolvable:$true] %s122_s23 }
   0x6   :  { %51 = vperm.xlu1 %143, %v19_v3   ;;  %29 = vperm.xlu0 %142, %v19_v3   ;;  %v110_v45 = vld [vmem:[%s226_s0] sm:$0xff]  ;;  %s150_s26 = scalar_lea.vmem %s123_s23, 256  ;;  %p155_p1 = scmp.lt.s32.totalorder %s123_s23, %s123_s23 }
   0x7   :  { %v34_v10 = vsub.s32 0, %v33_v8  ;;  %v56_v16 = vsub.s32 1, %v33_v8  ;;  %v72_v17 = vsub.s32 2, %v33_v8  ;;  %v88_v19 = vsub.s32 3, %v33_v8  ;;  %p151_p0 = scmp.ne.s32.totalorder %s123_s23, %s150_s26  ;;  %p156_p2 = scmp.lt.s32.totalorder %s150_s26, %s150_s26 }
   0x8   :  { %v104_v28 = vsub.s32 4, %v33_v8 }
   0x9   :  { %v35_v13 = vrot.slane %v20_v12, %v34_v10  ;;  %v57_v22 = vrot.slane %v20_v12, %v56_v16  ;;  %v73_v24 = vrot.slane %v20_v12, %v72_v17  ;;  %v89_v27 = vrot.slane %v20_v12, %v88_v19  ;;  %p157_p3 = por %p156_p2, %p155_p1 }
   0xa   :  { %145 = vset.pattern.permute.xlu1 %v174_v4  ;;  %144 = vset.pattern.permute.xlu0 %v174_v4  ;;  %v105_v36 = vrot.slane %v20_v12, %v104_v28 }
   0xb   :  { %67 = vperm.xlu1 %145, %v19_v3   ;;  %63 = vperm.xlu0 %144, %v18_v0   ;;  %p158_p4 = pnand %p157_p3, %p151_p0 }
   0xf   :  { %146 = vset.pattern.permute.xlu1 %v175_v5  ;;  %147 = vset.pattern.permute.xlu0 %v175_v5 }
  0x10   :  { %79 = vperm.xlu1 %146, %v18_v0   ;;  %83 = vperm.xlu0 %147, %v19_v3  }
  0x14   :  { %148 = vset.pattern.permute.xlu1 %v176_v6  ;;  %149 = vset.pattern.permute.xlu0 %v176_v6 }
  0x15   :  { %95 = vperm.xlu1 %148, %v18_v0  }
  0x19   :  { %99 = vperm.xlu1 %148, %v19_v3  }
  0x7d   :  { %v48_v9 = vpop.permute.xlu1 %47  ;;  %v25_v11 = vpop.permute.xlu0 %24 }
  0x7e   :  { %v36_v18 = vmul.f32 %v35_v13, %v25_v11  ;;  %v58_v29 = vmul.f32 %v57_v22, %v48_v9 }
  0x80   :  { %v44_v26 = vadd.f32 %v133_v20, %v36_v18 }
  0x81   :  { %v52_v14 = vpop.permute.xlu1 %51  ;;  %v30_v15 = vpop.permute.xlu0 %29 }
  0x82   :  { %v37_v23 = vmul.f32 %v35_v13, %v30_v15  ;;  %v59_v33 = vmul.f32 %v57_v22, %v52_v14  ;;  %v60_v34 = vadd.f32 %v58_v29, %v44_v26 }
  0x84   :  { %v45_v30 = vadd.f32 %v133_v20, %v37_v23 }
  0x86   :  { %v68_v21 = vpop.permute.xlu1 %67  ;;  %v64_v25 = vpop.permute.xlu0 %63  ;;  %v61_v38 = vadd.f32 %v59_v33, %v45_v30 }
  0x87   :  { %v74_v31 = vmul.f32 %v73_v24, %v64_v25  ;;  %v75_v39 = vmul.f32 %v73_v24, %v68_v21 }
  0x89   :  { %v76_v40 = vadd.f32 %v74_v31, %v60_v34  ;;  %v77_v46 = vadd.f32 %v75_v39, %v61_v38 }
  0x8b   :  { %v80_v32 = vpop.permute.xlu1 %79  ;;  %v84_v37 = vpop.permute.xlu0 %83 }
  0x8c   :  { %v90_v35 = vmul.f32 %v89_v27, %v80_v32  ;;  %v91_v43 = vmul.f32 %v89_v27, %v84_v37 }
  0x8e   :  { %v92_v42 = vadd.f32 %v90_v35, %v76_v40  ;;  %v93_v49 = vadd.f32 %v91_v43, %v77_v46 }
  0x90   :  { %v96_v41 = vpop.permute.xlu1 %95 }
  0x91   :  { %v106_v44 = vmul.f32 %v105_v36, %v96_v41 }
  0x93   :  { %v108_v47 = vadd.f32 %v106_v44, %v92_v42 }
  0x94   :  { %v100_v48 = vpop.permute.xlu1 %99 }
  0x95   :  { %v112_v50 = vadd.f32 %v110_v45, %v108_v47  ;;  %v107_v51 = vmul.f32 %v105_v36, %v100_v48 }
  0x97   :  { %115 = vst.msk [vmem:[#allocation2] sm:$0xff] %vm114_vm0, %v112_v50  ;;  %v109_v53 = vadd.f32 %v107_v51, %v93_v49 }
  0x99   :  { %v113_v54 = vadd.f32 %v111_v52, %v109_v53 }
  0x9b   :  { %116 = vst.msk [vmem:[#allocation2 + $0x8] sm:$0xff] %vm114_vm0, %v113_v54 }
  0x9c   :  { %161 = shalt.err (!%p158_p4)
}
  0x9d   :  { %s178_s27 = smov 128   ;;  %s179_s28 = smov 8  }
  0x9e   :  { %128 = dma.vmem_to_hbm [thread:$0]  %s123_s23, 256, %s230_s4, [#allocation3], %s178_s27, %s178_s27, %s179_s28  }
  0x9f   :  { %170 = dma.done.wait [#allocation3], 256  }
  0xa0   :  { %171 = vsyncadd [#allocation3], 4294967040 }
  0xa1   :  { %132 = vsyncpa [#allocation3], 1 }

</bundles_post_ra>
